<compile_context>
chip_gen: v6e
topology: v6e:2x2x1
jax: 0.10.0
libtpu: 0.0.40
codegen_flags: <defaults>
</compile_context>

<pallas_src>
import functools

import numpy as np
import jax
import jax.numpy as jnp
from jax import lax
from jax.experimental import pallas as pl
from jax.experimental.pallas import tpu as pltpu

BN_EPS = 1e-5


def _round_up(x, m):
    return ((x + m - 1) // m) * m


def _tensorcores_per_chip():
    """Best-effort TensorCore-per-chip count from the device kind."""
    try:
        kind = jax.devices()[0].device_kind.lower()
    except Exception:
        return 1
    if "lite" in kind or "v5e" in kind or "v6e" in kind or "v6" in kind:
        return 1          # v5e / v6e: single TensorCore per chip
    if "v7" in kind or "v5p" in kind or "v4" in kind:
        return 2          # dual-TC / megacore chips
    return 1


def _choose_tile_n(N, B, num_tc):
    """Row (N) tile: big tiles for large N (~85% of HBM roofline at 512 rows),
    no padding of tiny N up to 128, and >=2 grid steps only when the chip has 2 TCs."""
    if N < 128:
        return _round_up(max(N, 8), 8)     # single tile; out block == full dim
    if N >= 4096:
        tm = 1024
    elif N >= 1024:
        tm = 512
    elif N >= 256:
        tm = 256
    else:
        tm = 128
    # keep both TensorCores fed when the batch dim alone cannot
    while num_tc > 1 and B * ((N + tm - 1) // tm) < num_tc and tm > 128:
        tm //= 2
    return tm


def _vmem_block_bytes(shape, itemsize):
    s = list(shape)
    s[-1] = _round_up(s[-1], 128)
    if len(s) >= 2:
        s[-2] = _round_up(s[-2], 8)
    return int(np.prod(s)) * itemsize


# --------------------------------------------------------------------------- #
# Fused Pallas kernel:
#   in-VMEM 3-NN gather + inverse-distance weighting (weighted-selection matmul)
#   + [points1 || interp] first conv  +  full (conv1d 1x1 + BN(eval) + ReLU) chain
#   + channel-first output store                  -- all without leaving VMEM.
# --------------------------------------------------------------------------- #
def _fp_fused_kernel(*refs, n_extra, has_p1):
    i = 0
    wgt_ref = refs[i]; i += 1          # (1, TM, 3)    f32  inverse-distance weights
    idx_ref = refs[i]; i += 1          # (1, TM, 3)    i32  3-NN indices into points2
    p2_ref = refs[i]; i += 1           # (1, S, D2)    bf16 points2, resident per batch
    if has_p1:
        p1_ref = refs[i]; i += 1       # (1, TM, D1)   bf16 skip features
    w1b_ref = refs[i]; i += 1          # (D2, C1)      bf16
    if has_p1:
        w1a_ref = refs[i]; i += 1      # (D1, C1)      bf16
    b1_ref = refs[i]; i += 1           # (1, C1)       f32
    layers = []
    for _ in range(n_extra):
        layers.append((refs[i], refs[i + 1])); i += 2
    o_ref = refs[i]                    # (1, Cout, TM) f32  channel-first output tile

    w = wgt_ref[0]                     # (TM, 3) f32
    nbr = idx_ref[0]                   # (TM, 3) i32
    p2 = p2_ref[0]                     # (S, D2) bf16
    tm = w.shape[0]
    s = p2.shape[0]

    # 3-NN gather + inverse-distance weighting as ONE weighted-selection matmul:
    # sel[r, :] = sum_k w[r, k] * onehot(idx[r, k]).  Selection built in f32 on the
    # VPU (safe on v5e, no bf16 VALU there), cast to bf16 only for the MXU operand.
    col = lax.broadcasted_iota(jnp.int32, (tm, s), 1)
    sel = ((col == nbr[:, 0:1]).astype(jnp.float32) * w[:, 0:1]
           + (col == nbr[:, 1:2]).astype(jnp.float32) * w[:, 1:2]
           + (col == nbr[:, 2:3]).astype(jnp.float32) * w[:, 2:3])
    interp = jnp.dot(sel.astype(jnp.bfloat16), p2,
                     preferred_element_type=jnp.float32)           # (TM, D2) f32

    # layer 1:  concat([points1, interp]) @ W1  ==  p1 @ W1a + interp @ W1b
    h = jnp.dot(interp.astype(jnp.bfloat16), w1b_ref[...],
                preferred_element_type=jnp.float32)
    if has_p1:
        h = h + jnp.dot(p1_ref[0], w1a_ref[...],
                        preferred_element_type=jnp.float32)
    h = jnp.maximum(h + b1_ref[...], 0.0)

    # remaining conv/BN/ReLU layers chained in VMEM (no HBM round trips)
    for (w_ref, b_ref) in layers:
        h = jnp.dot(h.astype(jnp.bfloat16), w_ref[...],
                    preferred_element_type=jnp.float32)
        h = jnp.maximum(h + b_ref[...], 0.0)

    # channel-first, lane-dense (lane dim = N tile) output store
    o_ref[0, :, :] = h.T


def _fused_interp_mlp(prep, wgt, idx, p2, p1, mlp_channels):
    """wgt/idx [B,N,3], p2 [B,S,D2] bf16, p1 [B,N,D1] bf16 | None
       -> channel-first [B, mlp[-1], Np] f32 (Np >= N, padded rows are garbage)."""
    B, N, _ = wgt.shape
    S, D2 = p2.shape[1], p2.shape[2]
    has_p1 = p1 is not None
    assert prep["w1b"].shape[0] == D2

    num_tc = _tensorcores_per_chip()
    TM = _choose_tile_n(N, B, num_tc)
    Np = _round_up(N, TM)
    if Np != N:
        pad = ((0, 0), (0, Np - N), (0, 0))
        wgt = jnp.pad(wgt, pad)
        idx = jnp.pad(idx, pad)
        if has_p1:
            p1 = jnp.pad(p1, pad)

    n_extra = len(mlp_channels) - 1
    cout = mlp_channels[-1]

    inputs = [wgt, idx, p2]
    in_specs = [
        pl.BlockSpec((1, TM, 3), lambda b, i: (b, i, 0)),
        pl.BlockSpec((1, TM, 3), lambda b, i: (b, i, 0)),
        pl.BlockSpec((1, S, D2), lambda b, i: (b, 0, 0)),   # resident per batch
    ]
    if has_p1:
        D1 = p1.shape[2]
        assert prep["w1a"].shape[0] == D1
        inputs.append(p1)
        in_specs.append(pl.BlockSpec((1, TM, D1), lambda b, i: (b, i, 0)))

    def resident(arr):   # weight/bias: same full block every grid step
        nd = arr.ndim
        return pl.BlockSpec(arr.shape, lambda b, i: (0,) * nd)

    inputs.append(prep["w1b"]); in_specs.append(resident(prep["w1b"]))
    if has_p1:
        inputs.append(prep["w1a"]); in_specs.append(resident(prep["w1a"]))
    inputs.append(prep["b1"]); in_specs.append(resident(prep["b1"]))
    for (w_r, b_r) in prep["rest"]:
        inputs.append(w_r); in_specs.append(resident(w_r))
        inputs.append(b_r); in_specs.append(resident(b_r))

    # VMEM budget: double-buffered tile blocks + double-buffered resident weights
    # + rough allowance for in-kernel intermediates.  Only override the default
    # scoped limit when it would actually be exceeded (matters on v5e's ~16 MiB).
    blk = (_vmem_block_bytes((TM, 3), 4) + _vmem_block_bytes((TM, 3), 4)
           + _vmem_block_bytes((S, D2), 2) + _vmem_block_bytes((cout, TM), 4))
    if has_p1:
        blk += _vmem_block_bytes((TM, p1.shape[2]), 2)
    wt = sum(_vmem_block_bytes(a.shape, a.dtype.itemsize)
             for a in jax.tree_util.tree_leaves(prep))
    scratch = 3 * TM * _round_up(max(max(mlp_channels), S, D2), 128) * 4
    est = 2 * (blk + wt) + scratch
    vmem_limit = int(min(est + (8 << 20), 64 << 20)) if est > (12 << 20) else None
    # TODO(synk): for very wide/deep MLP stacks near the v7x 64 MiB VMEM ceiling, add
    #             pipeline_mode=pl.Buffered(1) on the resident weight specs.

    out = pl.pallas_call(
        functools.partial(_fp_fused_kernel, n_extra=n_extra, has_p1=has_p1),
        out_shape=jax.ShapeDtypeStruct((B, cout, Np), jnp.float32),
        grid=(B, Np // TM),
        in_specs=in_specs,
        out_specs=pl.BlockSpec((1, cout, TM), lambda b, i: (b, 0, i)),
        compiler_params=pltpu.CompilerParams(
            dimension_semantics=("parallel", "parallel"),
            vmem_limit_bytes=vmem_limit),
    )(*inputs)
    return out


# --------------------------------------------------------------------------- #
# Plain-JAX glue: 3-NN weights + indices (small [B,N,3] tensors only)
# --------------------------------------------------------------------------- #
def square_distance(src, dst):
    d = -2.0 * jnp.einsum("bnc,bmc->bnm", src, dst)
    d = d + jnp.sum(src ** 2, -1)[:, :, None]
    d = d + jnp.sum(dst ** 2, -1)[:, None, :]
    return d


def _interp_weights(xyz1, xyz2):
    """xyz1 [B,N,3], xyz2 [B,S,3] -> (w [B,N,3] f32, idx [B,N,3] i32)."""
    B, N, _ = xyz1.shape
    S = xyz2.shape[1]
    if S == 1:
        w = jnp.concatenate([jnp.ones((B, N, 1), jnp.float32),
                             jnp.zeros((B, N, 2), jnp.float32)], -1)
        return w, jnp.zeros((B, N, 3), jnp.int32)
    k = min(3, S)
    dists = square_distance(xyz1, xyz2)                 # [B,N,S]
    neg_d, idx = lax.top_k(-dists, k)                   # k nearest
    d = jnp.maximum(-neg_d, 1e-10)                      # matches torch: d[d<1e-10]=1e-10
    w = 1.0 / d
    w = w / jnp.sum(w, -1, keepdims=True)
    if k < 3:
        idx = jnp.pad(idx, ((0, 0), (0, 0), (0, 3 - k)))
        w = jnp.pad(w, ((0, 0), (0, 0), (0, 3 - k)))
    return w, idx.astype(jnp.int32)


# --------------------------------------------------------------------------- #
# Parameters: Conv1d(1x1) + BatchNorm1d(eval) folded, then one-time bf16 prep
# --------------------------------------------------------------------------- #
def init_fp_params(key, in_channel, mlp):
    """Per-layer Conv1d + BatchNorm1d parameters (PyTorch layout, eval-mode defaults)."""
    keys = jax.random.split(key, len(mlp))
    layers, last = [], in_channel
    for i, c in enumerate(mlp):
        kw, kb = jax.random.split(keys[i])
        layers.append(dict(
            conv_w=jax.random.normal(kw, (c, last), jnp.float32) / np.sqrt(last),
            conv_b=0.01 * jax.random.normal(kb, (c,), jnp.float32),
            gamma=jnp.ones((c,), jnp.float32), beta=jnp.zeros((c,), jnp.float32),
            mean=jnp.zeros((c,), jnp.float32), var=jnp.ones((c,), jnp.float32)))
        last = c
    return layers


def fold_conv_bn(layer, eps=BN_EPS):
    """y = gamma*(Wx+b - mean)/sqrt(var+eps) + beta  ->  x @ W_f + b_f  ([in,out] layout)."""
    s = layer["gamma"] / jnp.sqrt(layer["var"] + eps)            # (out,)
    w_f = (layer["conv_w"] * s[:, None]).T                       # (in, out)
    b_f = (layer["conv_b"] - layer["mean"]) * s + layer["beta"]  # (out,)
    return w_f, b_f


def prepare_fp_params(layers, d1, d2):
    """One-time prep: fold conv+BN, split the first-layer weight so the
    [points1 || interp] concat becomes two in-kernel matmuls, cast MXU operands to bf16."""
    folded = [fold_conv_bn(l) for l in layers]
    w1, b1 = folded[0]
    assert w1.shape[0] == d1 + d2
    prep = {"w1b": w1[d1:].astype(jnp.bfloat16), "b1": b1.reshape(1, -1)}
    if d1 > 0:
        prep["w1a"] = w1[:d1].astype(jnp.bfloat16)
    prep["rest"] = tuple((w.astype(jnp.bfloat16), b.reshape(1, -1))
                         for (w, b) in folded[1:])
    return prep, folded


# --------------------------------------------------------------------------- #
# Forward (PyTorch channel-first layout, like the nn.Module)
# --------------------------------------------------------------------------- #
@functools.partial(jax.jit, static_argnames=("mlp_channels",))
def feature_propagation_forward(prep, xyz1_cf, xyz2_cf, points1_cf, points2_cf, *,
                                mlp_channels):
    """xyz1 [B,3,N], xyz2 [B,3,S], points1 [B,D1,N] | None, points2 [B,D2,S]
       -> new_points [B, mlp[-1], N]."""
    xyz1 = jnp.transpose(xyz1_cf, (0, 2, 1)).astype(jnp.float32)     # [B,N,3]
    xyz2 = jnp.transpose(xyz2_cf, (0, 2, 1)).astype(jnp.float32)     # [B,S,3]
    B, N, _ = xyz1.shape

    w, idx = _interp_weights(xyz1, xyz2)                             # [B,N,3] each

    # bf16 BEFORE the transposes: halves wrapper traffic for the feature tensors
    p2 = jnp.transpose(points2_cf.astype(jnp.bfloat16), (0, 2, 1))   # [B,S,D2]
    p1 = None
    if points1_cf is not None:
        p1 = jnp.transpose(points1_cf.astype(jnp.bfloat16), (0, 2, 1))  # [B,N,D1]

    out_cf = _fused_interp_mlp(prep, w, idx, p2, p1, mlp_channels)   # [B,Cout,Np]
    return out_cf if out_cf.shape[2] == N else out_cf[:, :, :N]


# Pure-JAX f32 reference (same neighbour selection, exact gather) for correctness.
def fp_reference(folded_layers, xyz1_cf, xyz2_cf, points1_cf, points2_cf):
    xyz1 = jnp.transpose(xyz1_cf, (0, 2, 1)).astype(jnp.float32)
    xyz2 = jnp.transpose(xyz2_cf, (0, 2, 1)).astype(jnp.float32)
    points2 = jnp.transpose(points2_cf, (0, 2, 1)).astype(jnp.float32)
    B, N, _ = xyz1.shape
    D2 = points2.shape[-1]
    w, idx = _interp_weights(xyz1, xyz2)
    flat = idx.reshape(B, -1)
    gathered = jnp.take_along_axis(points2, flat[..., None], axis=1).reshape(B, N, 3, D2)
    interp = jnp.sum(gathered * w[..., None], axis=2)
    if points1_cf is not None:
        p1 = jnp.transpose(points1_cf, (0, 2, 1)).astype(jnp.float32)
        x = jnp.concatenate([p1, interp], -1)
    else:
        x = interp
    for (wm, b) in folded_layers:
        x = jnp.maximum(x @ wm + b, 0.0)
    return jnp.transpose(x, (0, 2, 1))


if __name__ == "__main__":
    B, N, S = 2, 64, 16          # N dense points, S sampled points
    D1, D2 = 32, 64              # points1 / points2 feature channels
    mlp = (64, 32)               # PointNetFeaturePropagation(in_channel=96, mlp=[64,32])

    key = jax.random.PRNGKey(0)
    kp, k1, k2, k3, k4 = jax.random.split(key, 5)

    layers = init_fp_params(kp, D1 + D2, mlp)
    prep, folded = prepare_fp_params(layers, D1, D2)

    xyz1 = jax.random.uniform(k1, (B, 3, N), jnp.float32)
    xyz2 = jax.random.uniform(k2, (B, 3, S), jnp.float32)
    points1 = jax.random.normal(k3, (B, D1, N), jnp.float32)
    points2 = jax.random.normal(k4, (B, D2, S), jnp.float32)

    out = feature_propagation_forward(prep, xyz1, xyz2, points1, points2,
                                      mlp_channels=mlp)
    out = jax.block_until_ready(out)
    assert out.shape == (B, mlp[-1], N), out.shape
    out_np = np.asarray(out)
    assert np.isfinite(out_np).all()

    ref_np = np.asarray(fp_reference(folded, xyz1, xyz2, points1, points2))
    # bf16 MXU operands with f32 accumulation vs f32 reference
    assert np.allclose(out_np, ref_np, atol=0.05, rtol=0.05), \
        float(np.max(np.abs(out_np - ref_np)))

    # points1 = None (no skip connection) path
    layers2 = init_fp_params(kp, D2, mlp)
    prep2, folded2 = prepare_fp_params(layers2, 0, D2)
    out2 = feature_propagation_forward(prep2, xyz1, xyz2, None, points2,
                                       mlp_channels=mlp)
    out2 = jax.block_until_ready(out2)
    assert out2.shape == (B, mlp[-1], N)
    ref2_np = np.asarray(fp_reference(folded2, xyz1, xyz2, None, points2))
    assert np.allclose(np.asarray(out2), ref2_np, atol=0.05, rtol=0.05), \
        float(np.max(np.abs(np.asarray(out2) - ref2_np)))

    print("KERNEL_OK")
</pallas_src>

<mosaic_0001>
module attributes {stable_mosaic.version = 11 : i64} {
  func.func @_fp_fused_kernel(%arg0: i32, %arg1: i32, %arg2: memref<1x64x3xf32, #tpu.memory_space<vmem>>, %arg3: memref<1x64x3xi32, #tpu.memory_space<vmem>>, %arg4: memref<1x16x64xbf16, #tpu.memory_space<vmem>>, %arg5: memref<1x64x32xbf16, #tpu.memory_space<vmem>>, %arg6: memref<64x64xbf16, #tpu.memory_space<vmem>>, %arg7: memref<32x64xbf16, #tpu.memory_space<vmem>>, %arg8: memref<1x64xf32, #tpu.memory_space<vmem>>, %arg9: memref<64x32xbf16, #tpu.memory_space<vmem>>, %arg10: memref<1x32xf32, #tpu.memory_space<vmem>>, %arg11: memref<1x32x64xf32, #tpu.memory_space<vmem>>) attributes {dimension_semantics = [#tpu.dimension_semantics<parallel>, #tpu.dimension_semantics<parallel>], iteration_bounds = array<i64: 2, 1>, scalar_prefetch = 0 : i64, scratch_operands = 0 : i64, tpu.core_type = #tpu.core_type<tc>, window_params = [{transform_indices = @transform_0, window_bounds = array<i64: 1, 64, 3>}, {transform_indices = @transform_1, window_bounds = array<i64: 1, 64, 3>}, {transform_indices = @transform_2, window_bounds = array<i64: 1, 16, 64>}, {transform_indices = @transform_3, window_bounds = array<i64: 1, 64, 32>}, {pipeline_mode = #tpu.pipeline_mode<synchronous>, transform_indices = @transform_4, window_bounds = array<i64: 64, 64>}, {pipeline_mode = #tpu.pipeline_mode<synchronous>, transform_indices = @transform_5, window_bounds = array<i64: 32, 64>}, {pipeline_mode = #tpu.pipeline_mode<synchronous>, transform_indices = @transform_6, window_bounds = array<i64: 1, 64>}, {pipeline_mode = #tpu.pipeline_mode<synchronous>, transform_indices = @transform_7, window_bounds = array<i64: 64, 32>}, {pipeline_mode = #tpu.pipeline_mode<synchronous>, transform_indices = @transform_8, window_bounds = array<i64: 1, 32>}, {transform_indices = @transform_9, window_bounds = array<i64: 1, 32, 64>}]} {
    %c0 = arith.constant 0 : index
    %c0_0 = arith.constant 0 : index
    %c0_1 = arith.constant 0 : index
    %0 = vector.load %arg2[%c0, %c0_0, %c0_1] : memref<1x64x3xf32, #tpu.memory_space<vmem>>, vector<1x64x3xf32>
    %1 = vector.shape_cast %0 : vector<1x64x3xf32> to vector<64x3xf32>
    %c0_2 = arith.constant 0 : index
    %c0_3 = arith.constant 0 : index
    %c0_4 = arith.constant 0 : index
    %2 = vector.load %arg3[%c0_2, %c0_3, %c0_4] : memref<1x64x3xi32, #tpu.memory_space<vmem>>, vector<1x64x3xi32>
    %3 = vector.shape_cast %2 : vector<1x64x3xi32> to vector<64x3xi32>
    %c0_5 = arith.constant 0 : index
    %c0_6 = arith.constant 0 : index
    %c0_7 = arith.constant 0 : index
    %4 = vector.load %arg4[%c0_5, %c0_6, %c0_7] : memref<1x16x64xbf16, #tpu.memory_space<vmem>>, vector<1x16x64xbf16>
    %5 = vector.shape_cast %4 : vector<1x16x64xbf16> to vector<16x64xbf16>
    %6 = tpu.iota {dimensions = array<i32: 1>} : vector<64x16xi32>
    %7 = vector.extract_strided_slice %3 {offsets = [0, 0], sizes = [64, 1], strides = [1, 1]} : vector<64x3xi32> to vector<64x1xi32>
    %8 = vector.broadcast %7 : vector<64x1xi32> to vector<64x16xi32>
    %9 = arith.cmpi eq, %6, %8 : vector<64x16xi32>
    %10 = arith.extui %9 : vector<64x16xi1> to vector<64x16xi32>
    %11 = arith.sitofp %10 : vector<64x16xi32> to vector<64x16xf32>
    %12 = vector.extract_strided_slice %1 {offsets = [0, 0], sizes = [64, 1], strides = [1, 1]} : vector<64x3xf32> to vector<64x1xf32>
    %13 = vector.broadcast %12 : vector<64x1xf32> to vector<64x16xf32>
    %14 = arith.mulf %11, %13 : vector<64x16xf32>
    %15 = vector.extract_strided_slice %3 {offsets = [0, 1], sizes = [64, 1], strides = [1, 1]} : vector<64x3xi32> to vector<64x1xi32>
    %16 = vector.broadcast %15 : vector<64x1xi32> to vector<64x16xi32>
    %17 = arith.cmpi eq, %6, %16 : vector<64x16xi32>
    %18 = arith.extui %17 : vector<64x16xi1> to vector<64x16xi32>
    %19 = arith.sitofp %18 : vector<64x16xi32> to vector<64x16xf32>
    %20 = vector.extract_strided_slice %1 {offsets = [0, 1], sizes = [64, 1], strides = [1, 1]} : vector<64x3xf32> to vector<64x1xf32>
    %21 = vector.broadcast %20 : vector<64x1xf32> to vector<64x16xf32>
    %22 = arith.mulf %19, %21 : vector<64x16xf32>
    %23 = arith.addf %14, %22 : vector<64x16xf32>
    %24 = vector.extract_strided_slice %3 {offsets = [0, 2], sizes = [64, 1], strides = [1, 1]} : vector<64x3xi32> to vector<64x1xi32>
    %25 = vector.broadcast %24 : vector<64x1xi32> to vector<64x16xi32>
    %26 = arith.cmpi eq, %6, %25 : vector<64x16xi32>
    %27 = arith.extui %26 : vector<64x16xi1> to vector<64x16xi32>
    %28 = arith.sitofp %27 : vector<64x16xi32> to vector<64x16xf32>
    %29 = vector.extract_strided_slice %1 {offsets = [0, 2], sizes = [64, 1], strides = [1, 1]} : vector<64x3xf32> to vector<64x1xf32>
    %30 = vector.broadcast %29 : vector<64x1xf32> to vector<64x16xf32>
    %31 = arith.mulf %28, %30 : vector<64x16xf32>
    %32 = arith.addf %23, %31 : vector<64x16xf32>
    %33 = arith.truncf %32 : vector<64x16xf32> to vector<64x16xbf16>
    %cst = arith.constant dense<0.000000e+00> : vector<64x64xf32>
    %34 = tpu.matmul %33, %5, %cst {dimension_numbers = #tpu.dot_dimension_numbers<[1], [0], [0], [1], [0, 0, 1, 1], [], []>} : vector<64x16xbf16>, vector<16x64xbf16>, vector<64x64xf32> -> vector<64x64xf32>
    %35 = arith.truncf %34 : vector<64x64xf32> to vector<64x64xbf16>
    %c0_8 = arith.constant 0 : index
    %c0_9 = arith.constant 0 : index
    %36 = vector.load %arg6[%c0_8, %c0_9] : memref<64x64xbf16, #tpu.memory_space<vmem>>, vector<64x64xbf16>
    %cst_10 = arith.constant dense<0.000000e+00> : vector<64x64xf32>
    %37 = tpu.matmul %35, %36, %cst_10 {dimension_numbers = #tpu.dot_dimension_numbers<[1], [0], [0], [1], [0, 0, 1, 1], [], []>} : vector<64x64xbf16>, vector<64x64xbf16>, vector<64x64xf32> -> vector<64x64xf32>
    %c0_11 = arith.constant 0 : index
    %c0_12 = arith.constant 0 : index
    %c0_13 = arith.constant 0 : index
    %38 = vector.load %arg5[%c0_11, %c0_12, %c0_13] : memref<1x64x32xbf16, #tpu.memory_space<vmem>>, vector<1x64x32xbf16>
    %39 = vector.shape_cast %38 : vector<1x64x32xbf16> to vector<64x32xbf16>
    %c0_14 = arith.constant 0 : index
    %c0_15 = arith.constant 0 : index
    %40 = vector.load %arg7[%c0_14, %c0_15] : memref<32x64xbf16, #tpu.memory_space<vmem>>, vector<32x64xbf16>
    %cst_16 = arith.constant dense<0.000000e+00> : vector<64x64xf32>
    %41 = tpu.matmul %39, %40, %cst_16 {dimension_numbers = #tpu.dot_dimension_numbers<[1], [0], [0], [1], [0, 0, 1, 1], [], []>} : vector<64x32xbf16>, vector<32x64xbf16>, vector<64x64xf32> -> vector<64x64xf32>
    %42 = arith.addf %37, %41 : vector<64x64xf32>
    %c0_17 = arith.constant 0 : index
    %c0_18 = arith.constant 0 : index
    %43 = vector.load %arg8[%c0_17, %c0_18] : memref<1x64xf32, #tpu.memory_space<vmem>>, vector<1x64xf32>
    %44 = vector.broadcast %43 : vector<1x64xf32> to vector<64x64xf32>
    %45 = arith.addf %42, %44 : vector<64x64xf32>
    %cst_19 = arith.constant 0.000000e+00 : f32
    %46 = vector.broadcast %cst_19 : f32 to vector<64x64xf32>
    %47 = arith.maximumf %45, %46 : vector<64x64xf32>
    %48 = arith.truncf %47 : vector<64x64xf32> to vector<64x64xbf16>
    %c0_20 = arith.constant 0 : index
    %c0_21 = arith.constant 0 : index
    %49 = vector.load %arg9[%c0_20, %c0_21] : memref<64x32xbf16, #tpu.memory_space<vmem>>, vector<64x32xbf16>
    %cst_22 = arith.constant dense<0.000000e+00> : vector<64x32xf32>
    %50 = tpu.matmul %48, %49, %cst_22 {dimension_numbers = #tpu.dot_dimension_numbers<[1], [0], [0], [1], [0, 0, 1, 1], [], []>} : vector<64x64xbf16>, vector<64x32xbf16>, vector<64x32xf32> -> vector<64x32xf32>
    %c0_23 = arith.constant 0 : index
    %c0_24 = arith.constant 0 : index
    %51 = vector.load %arg10[%c0_23, %c0_24] : memref<1x32xf32, #tpu.memory_space<vmem>>, vector<1x32xf32>
    %52 = vector.broadcast %51 : vector<1x32xf32> to vector<64x32xf32>
    %53 = arith.addf %50, %52 : vector<64x32xf32>
    %cst_25 = arith.constant 0.000000e+00 : f32
    %54 = vector.broadcast %cst_25 : f32 to vector<64x32xf32>
    %55 = arith.maximumf %53, %54 : vector<64x32xf32>
    %56 = tpu.transpose %55, [1, 0] : vector<64x32xf32> -> vector<32x64xf32>
    %c0_26 = arith.constant 0 : index
    %c0_27 = arith.constant 0 : index
    %c0_28 = arith.constant 0 : index
    %57 = vector.load %arg11[%c0_26, %c0_27, %c0_28] : memref<1x32x64xf32, #tpu.memory_space<vmem>>, vector<1x32x64xf32>
    %58 = vector.shape_cast %57 : vector<1x32x64xf32> to vector<32x64xf32>
    %59 = vector.shape_cast %56 : vector<32x64xf32> to vector<1x32x64xf32>
    tpu.vector_store %arg11[%c0_26, %c0_27, %c0_28], %59 {strides = array<i32>} : memref<1x32x64xf32, #tpu.memory_space<vmem>>, vector<1x32x64xf32>,
    return
  }
  func.func @transform_0(%arg0: i32, %arg1: i32) -> (i32, i32, i32) {
    %c0_i32 = arith.constant 0 : i32
    %c0_i32_0 = arith.constant 0 : i32
    return %arg0, %arg1, %c0_i32 : i32, i32, i32
  }
  func.func @transform_1(%arg0: i32, %arg1: i32) -> (i32, i32, i32) {
    %c0_i32 = arith.constant 0 : i32
    %c0_i32_0 = arith.constant 0 : i32
    return %arg0, %arg1, %c0_i32 : i32, i32, i32
  }
  func.func @transform_2(%arg0: i32, %arg1: i32) -> (i32, i32, i32) {
    %c0_i32 = arith.constant 0 : i32
    %c0_i32_0 = arith.constant 0 : i32
    %c0_i32_1 = arith.constant 0 : i32
    return %arg0, %c0_i32, %c0_i32_0 : i32, i32, i32
  }
  func.func @transform_3(%arg0: i32, %arg1: i32) -> (i32, i32, i32) {
    %c0_i32 = arith.constant 0 : i32
    %c0_i32_0 = arith.constant 0 : i32
    return %arg0, %arg1, %c0_i32 : i32, i32, i32
  }
  func.func @transform_4(%arg0: i32, %arg1: i32) -> (i32, i32) {
    %c0_i32 = arith.constant 0 : i32
    %c0_i32_0 = arith.constant 0 : i32
    %c0_i32_1 = arith.constant 0 : i32
    return %c0_i32, %c0_i32_0 : i32, i32
  }
  func.func @transform_5(%arg0: i32, %arg1: i32) -> (i32, i32) {
    %c0_i32 = arith.constant 0 : i32
    %c0_i32_0 = arith.constant 0 : i32
    %c0_i32_1 = arith.constant 0 : i32
    return %c0_i32, %c0_i32_0 : i32, i32
  }
  func.func @transform_6(%arg0: i32, %arg1: i32) -> (i32, i32) {
    %c0_i32 = arith.constant 0 : i32
    %c0_i32_0 = arith.constant 0 : i32
    %c0_i32_1 = arith.constant 0 : i32
    return %c0_i32, %c0_i32_0 : i32, i32
  }
  func.func @transform_7(%arg0: i32, %arg1: i32) -> (i32, i32) {
    %c0_i32 = arith.constant 0 : i32
    %c0_i32_0 = arith.constant 0 : i32
    %c0_i32_1 = arith.constant 0 : i32
    return %c0_i32, %c0_i32_0 : i32, i32
  }
  func.func @transform_8(%arg0: i32, %arg1: i32) -> (i32, i32) {
    %c0_i32 = arith.constant 0 : i32
    %c0_i32_0 = arith.constant 0 : i32
    %c0_i32_1 = arith.constant 0 : i32
    return %c0_i32, %c0_i32_0 : i32, i32
  }
  func.func @transform_9(%arg0: i32, %arg1: i32) -> (i32, i32, i32) {
    %c0_i32 = arith.constant 0 : i32
    %c0_i32_0 = arith.constant 0 : i32
    return %arg0, %c0_i32, %arg1 : i32, i32, i32
  }
}

</mosaic_0001>

<bundles_post_ra>
// kernel: feature_propagation_forward.1
= control target key start
LH: loop header
LB: loop body
LE: loop exit
PB: predicated region body
PF: predicated region fallthrough
CT: control target
= control target key end

     0   :  { %14 = vsyncpa [#allocation3], 0  ;;  %s2096_s0 = inlined_call_operand.vmem [shape: f32[2,64,3], index: 0, kind: input, shape index: {}]   ;;  %s2097_s1 = inlined_call_operand.vmem [shape: s32[2,64,3], index: 1, kind: input, shape index: {}]   ;;  %s2098_s2 = inlined_call_operand.vmem [shape: bf16[2,16,64], index: 2, kind: input, shape index: {}]   ;;  %s2099_s3 = inlined_call_operand.vmem [shape: bf16[2,64,32], index: 3, kind: input, shape index: {}]   ;;  %s2100_s4 = inlined_call_operand.vmem [shape: bf16[64,64], index: 4, kind: input, shape index: {}]   ;;  %s2101_s5 = inlined_call_operand.vmem [shape: bf16[32,64], index: 5, kind: input, shape index: {}]   ;;  %s2102_s6 = inlined_call_operand.vmem [shape: f32[1,64], index: 6, kind: input, shape index: {}]   ;;  %s2103_s7 = inlined_call_operand.vmem [shape: bf16[64,32], index: 7, kind: input, shape index: {}]   ;;  %s2104_s8 = inlined_call_operand.vmem [shape: f32[1,32], index: 8, kind: input, shape index: {}]   ;;  %s2105_s9 = inlined_call_operand.hbm [shape: f32[2,32,64], index: 9, kind: output, shape index: {}]  }
   0x1   :  { %16 = vsyncpa [#allocation3 + $0x1], 0  ;;  %s1809_s30 = smov 0   ;;  %s1811_s10 = smov 0  }
   0x2   :  { %s1813_s11 = smov 0   ;;  %s1815_s12 = smov 0  }
   0x3   :  { %s1817_s13 = smov 0   ;;  %s1819_s14 = smov 0  }
   0x4 LB: > { %s1414_s15 = sadd.s32 4294967295, %s1750_s14   ;;  %s1415_s16 = sadd.s32 4294967294, %s1750_s14   ;;  %s1750_s14 = sphi %s1819_s14, %s22_s14   ;;  %s1746_s13 = sphi %s1817_s13, %s2112_s13   ;;  %s1742_s12 = sphi %s1815_s12, %s2111_s12   ;;  %s1738_s11 = sphi %s1813_s11, %s2110_s11   ;;  %s1734_s10 = sphi %s1811_s10, %s2109_s10   ;;  %s1730_s30 = sphi %s1809_s30, %s2108_s30  }
   0x5   : > { %s34_s17 = sadd.s32 1, %s1746_s13  ;;  %s258_s18 = sadd.s32 1, %s1738_s11 }
   0x6   : > { %p36_p0 = scmp.ge.s32.totalorder %s34_s17, 2  ;;  %p268_p1 = scmp.ne.s32.totalorder %s1738_s11, %s1734_s10 }
   0x7   : > { %p269_p2 = scmp.eq.s32.totalorder %s1414_s15, 1  ;;  %p274_p3 = scmp.ne.s32.totalorder %s1734_s10, %s1730_s30 }
   0x8   : > { %s2114_s17 = smov (%p36_p0, %s34_s17), 0  ;;  %p275_p5 = scmp.eq.s32.totalorder %s1415_s16, 1 }
   0x9   : > { %p1849_p4 = por %p269_p2, %p268_p1  ;;  %s253_s20 = ssub.s32 %s1746_s13, %s2114_s17 }
   0xa   : > { %p1418_p6 = scmp.ge.s32.totalorder %s1750_s14, 1  ;;  %p256_p7 = scmp.eq.s32.totalorder %s253_s20, 0 }
   0xb   : > { %p1856_p8 = por %p275_p5, %p274_p3  ;;  %p355_p9 = scmp.lt.s32.totalorder %s1750_s14, 3 }
   0xc   : > { %s1862_s22 = scalar_select %p256_p7, %s1738_s11, %s258_s18  }
   0xd   : > { %p356_p10 = pnand %p1418_p6, %p355_p9 }
   0xe   : > { %p419_p11 = scmp.lt.s32.totalorder (!%p356_p10), %s1742_s12, 1  ;;  %s1494_s25 = sshll.u32 (!%p356_p10), %s1742_s12, 9 }
   0xf   : > { %359 = sbr.rel (%p356_p10) target bundleno = 1029 (0x405), region = 56  ;;  %s2048_s28 = scalar_lea.hbm (!%p356_p10), %s2105_s9, %s1494_s25 }
  0x14   : > { %v1752_v0 = vmov 1   ;;  %s1868_s23 = scalar_select %p419_p11, %s1742_s12, 1  ;;  %v1753_v6 = vmov 0   ;;  %v1754_v11 = vmov 2   ;;  %v1921_v26 = vld [vmem:[%s2100_s4 + $0x18] sm:$0xff]   ;;  %v472_v34 = vlaneseq }
  0x15   : > { %1639 = vset.pattern.permute.xlu0 %v1752_v0  ;;  %1637 = vset.pattern.permute.xlu1 %v1752_v0  ;;  %v1755_v40 = vmov 0.0   ;;  %vm772_vm13 = vcmask 130048   ;;  %s1756_s12 = smov [#allocation2]  }
  0x16   : > { %s1490_s24 = sshll.u32 %s1868_s23, 6  ;;  %s1492_s16 = sshll.u32 %s1868_s23, 3  ;;  %v1924_v37 = vand.u32 127, %v472_v34 }
  0x17   : > { %s1874_s27 = scalar_lea.vmem %s2097_s1, %s1490_s24  ;;  %s1887_s15 = scalar_lea.vmem %s2096_s0, %s1490_s24 }
  0x18   : > { %v464_v1 = vld [vmem:[%s1874_s27 + $0x10] sm:$0xff]  ;;  %v462_v2 = vld [vmem:[%s1874_s27] sm:$0xff]  ;;  %v463_v4 = vld [vmem:[%s1874_s27 + $0x8] sm:$0xff]  ;;  %s442_s24 = scalar_lea.vmem %s2098_s2, %s1492_s16  ;;  %s415_s16 = sand.u32 1, %s1734_s10  }
  0x19   : > { %577 = vperm.xlu0 %1639, %v464_v1   ;;  %571 = vperm.xlu1 %1637, %v462_v2   ;;  %v468_v3 = vld [vmem:[%s1874_s27 + $0x30] sm:$0xff]  ;;  %v465_v5 = vld [vmem:[%s1874_s27 + $0x18] sm:$0xff]  ;;  %v454_v7 = vld [vmem:[%s1887_s15] sm:$0xff]  ;;  %s1419_s18 = sshll.u32 %s415_s16, 5  ;;  %s2051_s29 = scalar_lea.sflag [#allocation3], %s415_s16 }
  0x1a   : > { %v455_v8 = vld [vmem:[%s1887_s15 + $0x8] sm:$0xff]  ;;  %v457_v9 = vld [vmem:[%s1887_s15 + $0x18] sm:$0xff]  ;;  %v456_v13 = vld [vmem:[%s1887_s15 + $0x10] sm:$0xff]  ;;  %s417_s20 = scalar_lea.vmem [#allocation2], %s1419_s18 }
  0x1b   : > { %v467_v10 = vld [vmem:[%s1874_s27 + $0x28] sm:$0xff]  ;;  %v461_v14 = vld [vmem:[%s1887_s15 + $0x38] sm:$0xff]  ;;  %v1659_v15 = vld [vmem:[%s442_s24] sm:$0xff]   ;;  %s1288_s24 = sshll.u32 %s417_s20, 4  ;;  %s2043_s24 = int_to_ptr.vmem [resolvable:$true] %s1288_s24 }
  0x1c   : > { %v459_v12 = vld [vmem:[%s1887_s15 + $0x28] sm:$0xff]  ;;  %1522 = vmatprep.subr.bf16.mxu0 %v1659_v15  ;;  %v466_v16 = vld [vmem:[%s1874_s27 + $0x20] sm:$0xff]  ;;  %v469_v17 = vld [vmem:[%s1874_s27 + $0x38] sm:$0xff]  ;;  %s1493_s27 = sshll.u32 %s1868_s23, 5  ;;  %s1678_s23 = sshll.u32 %s1756_s12, 4  ;;  %s1679_s23 = int_to_ptr.vmem [resolvable:$false] %s1678_s23 }
  0x1d   : > { %589 = vperm.xlu0 %1639, %v468_v3   ;;  %574 = vperm.xlu1 %1637, %v463_v4   ;;  %v458_v18 = vld [vmem:[%s1887_s15 + $0x20] sm:$0xff]  ;;  %v460_v19 = vld [vmem:[%s1887_s15 + $0x30] sm:$0xff]  ;;  %s451_s15 = scalar_lea.vmem %s2099_s3, %s1493_s27  ;;  %s1680_s18 = scalar_lea.vmem %s1679_s23, 1024 }
  0x1e   : > { %1523 = vmatpush3.bf16.msra.mxu0 %v1659_v15  ;;  %p1681_p1 = scmp.lt.s32.totalorder %s2043_s24, %s1679_s23 }
  0x1f   : > { %1544 = vmatprep.subr.bf16.mxu0 %v1921_v26 }
  0x21   : > { %1650 = vset.pattern.permute.xlu0 %v1753_v6  ;;  %1638 = vset.pattern.permute.xlu1 %v1753_v6 }
  0x22   : > { %475 = vperm.xlu0 %1650, %v462_v2   ;;  %484 = vperm.xlu1 %1638, %v465_v5  }
  0x26   : > { %478 = vperm.xlu0 %1650, %v463_v4   ;;  %1640 = vset.pattern.permute.xlu1 %v1752_v0 }
  0x27   : > { %580 = vperm.xlu1 %1640, %v465_v5  }
  0x2a   : > { %481 = vperm.xlu0 %1650, %v464_v1  }
  0x2b   : > { %1641 = vset.pattern.permute.xlu1 %v1753_v6 }
  0x2c   : > { %524 = vperm.xlu1 %1641, %v454_v7  }
  0x2e   : > { %529 = vperm.xlu0 %1650, %v455_v8  }
  0x30   : > { %1642 = vset.pattern.permute.xlu1 %v1752_v0 }
  0x31   : > { %619 = vperm.xlu1 %1642, %v454_v7  }
  0x32   : > { %539 = vperm.xlu0 %1650, %v457_v9  }
  0x35   : > { %623 = vperm.xlu1 %1642, %v455_v8  }
  0x36   : > { %490 = vperm.xlu0 %1650, %v467_v10  }
  0x39   : > { %1643 = vset.pattern.permute.xlu1 %v1754_v11 }
  0x3a   : > { %493 = vperm.xlu0 %1650, %v468_v3   ;;  %670 = vperm.xlu1 %1643, %v463_v4  }
  0x3e   : > { %549 = vperm.xlu0 %1650, %v459_v12   ;;  %1644 = vset.pattern.permute.xlu1 %v1753_v6 }
  0x3f   : > { %534 = vperm.xlu1 %1644, %v456_v13  }
  0x42   : > { %559 = vperm.xlu0 %1650, %v461_v14  }
  0x43   : > { %1645 = vset.pattern.permute.xlu1 %v1752_v0 }
  0x44   : > { %627 = vperm.xlu1 %1645, %v456_v13  }
  0x46   : > { %1656 = vset.pattern.permute.xlu0 %v1754_v11 }
  0x47   : > { %667 = vperm.xlu0 %1656, %v462_v2  }
  0x48   : > { %631 = vperm.xlu1 %1645, %v457_v9  }
  0x4b   : > { %673 = vperm.xlu0 %1656, %v464_v1  }
  0x4c   : > { %1646 = vset.pattern.permute.xlu1 %v1754_v11 }
  0x4d   : > { %676 = vperm.xlu1 %1646, %v465_v5  }
  0x4f   : > { %719 = vperm.xlu0 %1656, %v455_v8  }
  0x51   : > { %715 = vperm.xlu1 %1646, %v454_v7  }
  0x53   : > { %727 = vperm.xlu0 %1656, %v457_v9  }
  0x55   : > { %723 = vperm.xlu1 %1646, %v456_v13  }
  0x57   : > { %679 = vperm.xlu0 %1656, %v466_v16  }
  0x59   : > { %1647 = vset.pattern.permute.xlu1 %v1753_v6 }
  0x5a   : > { %487 = vperm.xlu1 %1647, %v466_v16  }
  0x5b   : > { %685 = vperm.xlu0 %1656, %v468_v3  }
  0x5e   : > { %1648 = vset.pattern.permute.xlu1 %v1752_v0 }
  0x5f   : > { %583 = vperm.xlu1 %1648, %v466_v16   ;;  %735 = vperm.xlu0 %1656, %v459_v12  }
  0x63   : > { %586 = vperm.xlu1 %1648, %v467_v10   ;;  %743 = vperm.xlu0 %1656, %v461_v14  }
  0x67   : > { %1649 = vset.pattern.permute.xlu1 %v1753_v6 }
  0x68   : > { %496 = vperm.xlu1 %1649, %v469_v17  }
  0x6c   : > { %1651 = vset.pattern.permute.xlu1 %v1752_v0 }
  0x6d   : > { %592 = vperm.xlu1 %1651, %v469_v17  }
  0x71   : > { %1652 = vset.pattern.permute.xlu1 %v1753_v6 }
  0x72   : > { %544 = vperm.xlu1 %1652, %v458_v18  }
  0x76   : > { %1653 = vset.pattern.permute.xlu1 %v1752_v0 }
  0x77   : > { %635 = vperm.xlu1 %1653, %v458_v18  }
  0x7b   : > { %639 = vperm.xlu1 %1653, %v459_v12  }
  0x7f   : > { %1654 = vset.pattern.permute.xlu1 %v1754_v11 }
  0x80   : > { %682 = vperm.xlu1 %1654, %v467_v10  }
  0x84   : > { %1655 = vset.pattern.permute.xlu1 %v1753_v6 }
  0x85   : > { %554 = vperm.xlu1 %1655, %v460_v19  }
  0x89   : > { %1657 = vset.pattern.permute.xlu1 %v1752_v0 }
  0x8a   : > { %643 = vperm.xlu1 %1657, %v460_v19  }
  0x8e   : > { %647 = vperm.xlu1 %1657, %v461_v14  }
  0x92   : > { %1658 = vset.pattern.permute.xlu1 %v1754_v11 }
  0x93   : > { %688 = vperm.xlu1 %1658, %v469_v17  }
  0x94   : > { %v572_v20 = vpop.permute.xlu1 %571  ;;  %v578_v21 = vpop.permute.xlu0 %577 }
  0x95   : > { %vm594_vm2 = vcmp.eq.s32.totalorder %v1924_v37, %v572_v20  ;;  %vm596_vm5 = vcmp.eq.s32.totalorder %v1924_v37, %v578_v21 }
  0x96   : > { %v1436_v52 = vsel %vm594_vm2, 1.0, %v1755_v40  ;;  %v1438_v59 = vsel %vm596_vm5, 1.0, %v1755_v40 }
  0x97   : > { %731 = vperm.xlu1 %1658, %v458_v18  }
  0x98   : > { %v575_v22 = vpop.permute.xlu1 %574  ;;  %v1916_v23 = vpop.permute.xlu0 %589 }
  0x99   : > { %vm595_vm4 = vcmp.eq.s32.totalorder %v1924_v37, %v575_v22  ;;  %vm600_vm14 = vcmp.eq.s32.totalorder %v1924_v37, %v1916_v23 }
  0x9a   : > { %v1437_v54 = vsel %vm595_vm4, 1.0, %v1755_v40 }
  0x9b   : > { %739 = vperm.xlu1 %1658, %v460_v19  }
  0x9d   : > { %v476_v24 = vpop.permute.xlu0 %475  ;;  %v485_v25 = vpop.permute.xlu1 %484 }
  0x9e   : > { %vm498_vm3 = vcmp.eq.s32.totalorder %v1924_v37, %v476_v24  ;;  %vm501_vm8 = vcmp.eq.s32.totalorder %v1924_v37, %v485_v25 }
  0x9f   : > { %v1428_v51 = vsel %vm498_vm3, 1.0, %v1755_v40  ;;  %v1431_v1 = vsel %vm501_vm8, 1.0, %v1755_v40 }
  0xa1   : > { %v479_v27 = vpop.permute.xlu0 %478 }
  0xa2   : > { %v581_v28 = vpop.permute.xlu1 %580  ;;  %vm499_vm1 = vcmp.eq.s32.totalorder %v1924_v37, %v479_v27 }
  0xa3   : > { %v1429_v49 = vsel %vm499_vm1, 1.0, %v1755_v40  ;;  %vm597_vm9 = vcmp.eq.s32.totalorder %v1924_v37, %v581_v28  ;;  %v1661_v28 = vld [vmem:[%s2100_s4 + $0x10] sm:$0xff]  }
  0xa4   : > { %v1439_v3 = vsel %vm597_vm9, 1.0, %v1755_v40  ;;  %vm906_vm9 = vcmask 261120  }
  0xa5   : > { %v482_v29 = vpop.permute.xlu0 %481 }
  0xa6   : > { %vm500_vm10 = vcmp.eq.s32.totalorder %v1924_v37, %v482_v29 }
  0xa7   : > { %v525_v30 = vpop.permute.xlu1 %524  ;;  %v1430_v2 = vsel %vm500_vm10, 1.0, %v1755_v40  ;;  %vm1008_vm10 = vcmask 523264  }
  0xa8   : > { %v562_v58 = vmul.f32 %v1428_v51, %v525_v30 }
  0xa9   : > { %v530_v31 = vpop.permute.xlu0 %529 }
  0xaa   : > { %v563_v56 = vmul.f32 %v1429_v49, %v530_v31 }
  0xac   : > { %v620_v32 = vpop.permute.xlu1 %619 }
  0xad   : > { %v540_v33 = vpop.permute.xlu0 %539  ;;  %v650_v53 = vmul.f32 %v1436_v52, %v620_v32 }
  0xae   : > { %v565_v9 = vmul.f32 %v1431_v1, %v540_v33 }
  0xaf   : > { %v658_v0 = vadd.f32 %v650_v53, %v562_v58 }
  0xb0   : > { %v624_v35 = vpop.permute.xlu1 %623 }
  0xb1   : > { %v491_v36 = vpop.permute.xlu0 %490  ;;  %v651_v57 = vmul.f32 %v1437_v54, %v624_v35 }
  0xb2   : > { %vm503_vm0 = vcmp.eq.s32.totalorder %v1924_v37, %v491_v36 }
  0xb3   : > { %v1433_v41 = vsel %vm503_vm0, 1.0, %v1755_v40  ;;  %v659_v5 = vadd.f32 %v651_v57, %v563_v56 }
  0xb5   : > { %v671_v38 = vpop.permute.xlu1 %670  ;;  %v1927_v39 = vpop.permute.xlu0 %493 }
  0xb6   : > { %vm691_vm6 = vcmp.eq.s32.totalorder %v1924_v37, %v671_v38  ;;  %vm504_vm15 = vcmp.eq.s32.totalorder %v1924_v37, %v1927_v39 }
  0xb7   : > { %v1445_v61 = vsel %vm691_vm6, 1.0, %v1755_v40 }
  0xb9   : > { %v550_v42 = vpop.permute.xlu0 %549 }
  0xba   : > { %v1930_v43 = vmul.f32 %v1433_v41, %v550_v42  ;;  %v535_v44 = vpop.permute.xlu1 %534  ;;  %v1442_v42 = vsel %vm600_vm14, 1.0, %v1755_v40 }
  0xbb   : > { %v564_v13 = vmul.f32 %v1430_v2, %v535_v44 }
  0xbd   : > { %v1932_v45 = vpop.permute.xlu0 %559 }
  0xbf   : > { %v628_v46 = vpop.permute.xlu1 %627 }
  0xc0   : > { %v652_v6 = vmul.f32 %v1438_v59, %v628_v46 }
  0xc2   : > { %v668_v47 = vpop.permute.xlu0 %667  ;;  %v660_v18 = vadd.f32 %v652_v6, %v564_v13  ;;  %v1662_v13 = vld [vmem:[%s2101_s5 + $0x8] sm:$0xff]  }
  0xc3   : > { %v632_v48 = vpop.permute.xlu1 %631  ;;  %vm690_vm7 = vcmp.eq.s32.totalorder %v1924_v37, %v668_v47  ;;  %1532 = vmatprep.subr.bf16.mxu1 %v1662_v13 }
  0xc4   : > { %v1444_v62 = vsel %vm690_vm7, 1.0, %v1755_v40  ;;  %v653_v7 = vmul.f32 %v1439_v3, %v632_v48  ;;  %1533 = vmatpush3.bf16.msra.mxu1 %v1662_v13 }
  0xc6   : > { %v674_v50 = vpop.permute.xlu0 %673  ;;  %v661_v19 = vadd.f32 %v653_v7, %v565_v9 }
  0xc7   : > { %vm692_vm11 = vcmp.eq.s32.totalorder %v1924_v37, %v674_v50 }
  0xc8   : > { %v677_v55 = vpop.permute.xlu1 %676  ;;  %v1446_v12 = vsel %vm692_vm11, 1.0, %v1755_v40 }
  0xc9   : > { %vm693_vm12 = vcmp.eq.s32.totalorder %v1924_v37, %v677_v55 }
  0xca   : > { %v720_v60 = vpop.permute.xlu0 %719  ;;  %v1447_v11 = vsel %vm693_vm12, 1.0, %v1755_v40 }
  0xcb   : > { %v747_v63 = vmul.f32 %v1445_v61, %v720_v60 }
  0xcc   : > { %v716_v4 = vpop.permute.xlu1 %715 }
  0xcd   : > { %v746_v8 = vmul.f32 %v1444_v62, %v716_v4  ;;  %v755_v14 = vadd.f32 %v747_v63, %v659_v5 }
  0xce   : > { %v728_v10 = vpop.permute.xlu0 %727 }
  0xcf   : > { %v754_v15 = vadd.f32 %v746_v8, %v658_v0  ;;  %v749_v16 = vmul.f32 %v1447_v11, %v728_v10 }
  0xd0   : > { %v724_v17 = vpop.permute.xlu1 %723 }
  0xd1   : > { %v748_v20 = vmul.f32 %v1446_v12, %v724_v17  ;;  %v762_v21 = vpack.c.bf16 %v755_v14, %v754_v15  ;;  %v757_v22 = vadd.f32 %v749_v16, %v661_v19  ;;  %v1664_v15 = vld [vmem:[%s2101_s5] sm:$0xff]   ;;  %v1668_v19 = vld [vmem:[%s451_s15 + $0x10] sm:$0xff]  }
  0xd2   : > { %v680_v41 = vpop.permute.xlu0 %679  ;;  %v1665_v16 = vld [vmem:[%s2100_s4] sm:$0xff]   ;;  %1534 = vmatprep.subr.bf16.mxu1 %v1664_v15 }
  0xd3   : > { %v756_v24 = vadd.f32 %v748_v20, %v660_v18  ;;  %1524 = vmatprep.mubr.msk.bf16.mxu0 %vm772_vm13, %v762_v21  ;;  %vm694_vm4 = vcmp.eq.s32.totalorder %v1924_v37, %v680_v41  ;;  %1535 = vmatpush3.bf16.msra.mxu1 %v1664_v15  ;;  %v1666_v17 = vld [vmem:[%s451_s15] sm:$0xff]   ;;  %v1667_v18 = vld [vmem:[%s451_s15 + $0x8] sm:$0xff]   ;;  %v1669_v20 = vld [vmem:[%s451_s15 + $0x18] sm:$0xff]   ;;  %s1674_s15 = scalar_lea.vmem %s2043_s24, 512 }
  0xd4   : > { %v1448_v59 = vsel %vm694_vm4, 1.0, %v1755_v40  ;;  %1536 = vmatprep.mubr.msk.bf16.mxu1 %vm906_vm9, %v1666_v17  ;;  %v1673_v41 = vld [vmem:[%s2103_s7] sm:$0xff]   ;;  %p1675_p12 = scmp.ne.s32.totalorder %s2043_s24, %s1674_s15  ;;  %p1682_p2 = scmp.lt.s32.totalorder %s1680_s18, %s1674_s15 }
  0xd5   : > { %v763_v25 = vpack.c.bf16 %v757_v22, %v756_v24  ;;  %v488_v27 = vpop.permute.xlu1 %487 }
  0xd6   : > { %v686_v48 = vpop.permute.xlu0 %685  ;;  %vm502_vm3 = vcmp.eq.s32.totalorder %v1924_v37, %v488_v27  ;;  %1537 = vmatmul.mubr.msk.bf16.vlgmr.msra.gmra.mxu1 %vm906_vm9, %v1667_v18  ;;  %p1676_p13 = pnand %p1675_p12, %p1849_p4  ;;  %p1683_p3 = por %p1682_p2, %p1681_p1 }
  0xd7   : > { %1525 = vmatmul.mubr.msk.bf16.vlgmr.msra.gmra.mxu0 %vm772_vm13, %v763_v25  ;;  %v1432_v56 = vsel %vm502_vm3, 1.0, %v1755_v40  ;;  %vm696_vm8 = vcmp.eq.s32.totalorder %v1924_v37, %v686_v48  ;;  %1540 = vmatprep.mubr.msk.bf16.mxu1 %vm906_vm9, %v1668_v19  ;;  %v1476_v19 = vld [vmem:[%s2104_s8] ss:$0 sm:$0xff] }
  0xd8   : > { %1545 = vmatpush3.bf16.msra.mxu0 %v1921_v26  ;;  %v1434_v26 = vsel %vm504_vm15, 1.0, %v1755_v40  ;;  %v1450_v9 = vsel %vm696_vm8, 1.0, %v1755_v40  ;;  %p1677_p0 = pneg %p1676_p13 }
  0xd9   : > { %1546 = vmatprep.subr.bf16.mxu0 %v1661_v28 }
  0xda   : > { %v584_v29 = vpop.permute.xlu1 %583  ;;  %v736_v39 = vpop.permute.xlu0 %735  ;;  %p1684_p5 = pnand %p1683_p3, %p1677_p0 }
  0xdb   : > { %vm598_vm0 = vcmp.eq.s32.totalorder %v1924_v37, %v584_v29 }
  0xdc   : > { %1547 = vmatpush3.bf16.msra.mxu0 %v1661_v28  ;;  %v1440_v23 = vsel %vm598_vm0, 1.0, %v1755_v40 }
  0xde   : > { %v587_v30 = vpop.permute.xlu1 %586  ;;  %v744_v4 = vpop.permute.xlu0 %743  ;;  %1541 = vmatmul.mubr.msk.bf16.gmra.mxu1 %vm906_vm9, %v1669_v20 }
  0xdf   : > { %vm599_vm1 = vcmp.eq.s32.totalorder %v1924_v37, %v587_v30 }
  0xe0   : > { %v1441_v51 = vsel %vm599_vm1, 1.0, %v1755_v40 }
  0xe3   : > { %v497_v31 = vpop.permute.xlu1 %496 }
  0xe4   : > { %vm505_vm5 = vcmp.eq.s32.totalorder %v1924_v37, %v497_v31  ;;  %v1670_v31 = vld [vmem:[%s2103_s7 + $0x18] sm:$0xff]  }
  0xe5   : > { %v1435_v60 = vsel %vm505_vm5, 1.0, %v1755_v40  ;;  %1560 = vmatprep.subr.bf16.mxu1 %v1670_v31 }
  0xe6   : > { %v569_v5 = vmul.f32 %v1435_v60, %v1932_v45  ;;  %1561 = vmatpush3.bf16.msra.mxu1 %v1670_v31 }
  0xe8   : > { %v593_v32 = vpop.permute.xlu1 %592 }
  0xe9   : > { %vm601_vm6 = vcmp.eq.s32.totalorder %v1924_v37, %v593_v32 }
  0xea   : > { %v1443_v61 = vsel %vm601_vm6, 1.0, %v1755_v40 }
  0xed   : > { %v545_v33 = vpop.permute.xlu1 %544 }
  0xee   : > { %v566_v57 = vmul.f32 %v1432_v56, %v545_v33 }
  0xf2   : > { %v636_v34 = vpop.permute.xlu1 %635 }
  0xf3   : > { %v654_v54 = vmul.f32 %v1440_v23, %v636_v34  ;;  %v1671_v34 = vld [vmem:[%s2103_s7 + $0x10] sm:$0xff]  }
  0xf4   : > { %1562 = vmatprep.subr.bf16.mxu1 %v1671_v34 }
  0xf5   : > { %v662_v0 = vadd.f32 %v654_v54, %v566_v57  ;;  %1563 = vmatpush3.bf16.msra.mxu1 %v1671_v34 }
  0xf6   : > { %v640_v35 = vpop.permute.xlu1 %639 }
  0xf7   : > { %v655_v55 = vmul.f32 %v1441_v51, %v640_v35 }
  0xf9   : > { %v663_v1 = vadd.f32 %v655_v55, %v1930_v43  ;;  %v1663_v43 = vld [vmem:[%s2100_s4 + $0x8] sm:$0xff]  }
  0xfa   : > { %1548 = vmatprep.subr.bf16.mxu0 %v1663_v43 }
  0xfb   : > { %v683_v36 = vpop.permute.xlu1 %682  ;;  %1549 = vmatpush3.bf16.msra.mxu0 %v1663_v43 }
  0xfc   : > { %vm695_vm2 = vcmp.eq.s32.totalorder %v1924_v37, %v683_v36  ;;  %1550 = vmatprep.subr.bf16.mxu0 %v1665_v16 }
  0xfd   : > { %v1449_v52 = vsel %vm695_vm2, 1.0, %v1755_v40 }
  0xfe   : > { %v751_v58 = vmul.f32 %v1449_v52, %v736_v39  ;;  %v1475_v39 = vld [vmem:[%s2102_s6] ss:$0 sm:$0xff] }
  0xff   : > { %1551 = vmatpush3.bf16.msra.mxu0 %v1665_v16 }
 0x100   : > { %v555_v38 = vpop.permute.xlu1 %554  ;;  %v759_v6 = vadd.f32 %v751_v58, %v663_v1 }
 0x101   : > { %v568_v46 = vmul.f32 %v1434_v26, %v555_v38  ;;  %v1672_v38 = vld [vmem:[%s2103_s7 + $0x8] sm:$0xff]  }
 0x102   : > { %1564 = vmatprep.subr.bf16.mxu1 %v1672_v38 }
 0x103   : > { %1565 = vmatpush3.bf16.msra.mxu1 %v1672_v38 }
 0x104   : > { %1566 = vmatprep.subr.bf16.mxu1 %v1673_v41 }
 0x105   : > { %v644_v44 = vpop.permute.xlu1 %643 }
 0x106   : > { %v656_v47 = vmul.f32 %v1442_v42, %v644_v44 }
 0x107   : > { %1567 = vmatpush3.bf16.msra.mxu1 %v1673_v41 }
 0x108   : > { %v664_v49 = vadd.f32 %v656_v47, %v568_v46 }
 0x109   : > { %v648_v50 = vpop.permute.xlu1 %647 }
 0x10a   : > { %v657_v2 = vmul.f32 %v1443_v61, %v648_v50 }
 0x10e   : > { %v689_v53 = vpop.permute.xlu1 %688 }
 0x10f   : > { %vm697_vm7 = vcmp.eq.s32.totalorder %v1924_v37, %v689_v53  ;;  %v665_v37 = vadd.f32 %v657_v2, %v569_v5 }
 0x110   : > { %v1451_v62 = vsel %vm697_vm7, 1.0, %v1755_v40 }
 0x111   : > { %v753_v7 = vmul.f32 %v1451_v62, %v744_v4 }
 0x112   : > { %v732_v63 = vpop.permute.xlu1 %731 }
 0x113   : > { %v750_v3 = vmul.f32 %v1448_v59, %v732_v63  ;;  %v761_v14 = vadd.f32 %v753_v7, %v665_v37 }
 0x115   : > { %v758_v8 = vadd.f32 %v750_v3, %v662_v0 }
 0x116   : > { %v740_v10 = vpop.permute.xlu1 %739 }
 0x117   : > { %v764_v11 = vpack.c.bf16 %v759_v6, %v758_v8  ;;  %v752_v12 = vmul.f32 %v1450_v9, %v740_v10 }
 0x119   : > { %v760_v45 = vadd.f32 %v752_v12, %v664_v49  ;;  %1528 = vmatprep.mubr.msk.bf16.mxu0 %vm772_vm13, %v764_v11 }
 0x11b   : > { %v765_v40 = vpack.c.bf16 %v761_v14, %v760_v45 }
 0x11d   : > { %1529 = vmatmul.mubr.msk.bf16.gmra.mxu0 %vm772_vm13, %v765_v40 }
 0x196   : > { %v1538_v26 = vpop.f32.mrf.mxu1 }
 0x197   : > { %v1526_v21 = vpop.f32.mrf.mxu0 }
 0x198   : > { %v953_v42 = vpop.f32.mrf.mxu1 }
 0x199   : > { %v819_v22 = vpop.f32.mrf.mxu0 }
 0x19a   : > { %v1539_v46 = vpop.f32.mrf.mxu1 }
 0x19b   : > { %v1527_v24 = vpop.f32.mrf.mxu0 }
 0x19c   : > { %v851_v28 = vpack.c.bf16 %v1527_v24, %v1526_v21  ;;  %v956_v23 = vpop.f32.mrf.mxu1 }
 0x19d   : > { %v822_v25 = vpop.f32.mrf.mxu0 }
 0x19e   : > { %v850_v27 = vpack.c.bf16 %v822_v25, %v819_v22  ;;  %v1542_v0 = vpop.f32.mrf.mxu1 }
 0x1a0   : > { %1552 = vmatprep.mubr.msk.bf16.mxu0 %vm1008_vm10, %v850_v27  ;;  %v969_v1 = vpop.f32.mrf.mxu1 }
 0x1a1   : > { %1553 = vmatmul.mubr.msk.bf16.vlgmr.msra.gmra.mxu0 %vm1008_vm10, %v851_v28 }
 0x1a2   : > { %v1543_v3 = vpop.f32.mrf.mxu1 }
 0x1a4   : > { %v972_v9 = vpop.f32.mrf.mxu1 }
 0x1dd   : > { %v1530_v29 = vpop.f32.mrf.mxu0 }
 0x1df   : > { %v835_v30 = vpop.f32.mrf.mxu0 }
 0x1e1   : > { %v1531_v32 = vpop.f32.mrf.mxu0 }
 0x1e2   : > { %v853_v36 = vpack.c.bf16 %v1531_v32, %v1530_v29 }
 0x1e3   : > { %v838_v33 = vpop.f32.mrf.mxu0 }
 0x1e4   : > { %v852_v35 = vpack.c.bf16 %v838_v33, %v835_v30 }
 0x1e6   : > { %1556 = vmatprep.mubr.msk.bf16.mxu0 %vm1008_vm10, %v852_v35 }
 0x1e7   : > { %1557 = vmatmul.mubr.msk.bf16.gmra.mxu0 %vm1008_vm10, %v853_v36 }
 0x261   : > { %v1554_v44 = vpop.f32.mrf.mxu0 }
 0x262   : > { %v1064_v49 = vadd.f32 %v1554_v44, %v1538_v26 }
 0x263   : > { %v1055_v47 = vpop.f32.mrf.mxu0 }
 0x264   : > { %v1056_v48 = vadd.f32 %v1055_v47, %v953_v42  ;;  %v1095_v56 = vadd.f32 %v1475_v39, %v1064_v49 }
 0x265   : > { %v1555_v50 = vpop.f32.mrf.mxu0 }
 0x266   : > { %v1067_v51 = vadd.f32 %v1555_v50, %v1539_v46  ;;  %v1093_v53 = vadd.f32 %v1475_v39, %v1056_v48  ;;  %v1103_v61 = vmax.f32 %v1095_v56, 0.0 }
 0x267   : > { %v1058_v52 = vpop.f32.mrf.mxu0 }
 0x268   : > { %v1096_v54 = vadd.f32 %v1475_v39, %v1067_v51  ;;  %v1059_v55 = vadd.f32 %v1058_v52, %v956_v23  ;;  %v1101_v59 = vmax.f32 %v1093_v53, 0.0 }
 0x26a   : > { %v1094_v57 = vadd.f32 %v1475_v39, %v1059_v55  ;;  %v1104_v58 = vmax.f32 %v1096_v54, 0.0 }
 0x26c   : > { %v1102_v60 = vmax.f32 %v1094_v57, 0.0  ;;  %v1110_v63 = vpack.c.bf16 %v1104_v58, %v1103_v61 }
 0x26e   : > { %v1109_v62 = vpack.c.bf16 %v1102_v60, %v1101_v59 }
 0x270   : > { %1568 = vmatprep.mubr.msk.bf16.mxu1 %vm1008_vm10, %v1109_v62 }
 0x271   : > { %1569 = vmatmul.mubr.msk.bf16.vlgmr.msra.gmra.mxu1 %vm1008_vm10, %v1110_v63 }
 0x2a7   : > { %v1558_v2 = vpop.f32.mrf.mxu0 }
 0x2a8   : > { %v1080_v6 = vadd.f32 %v1558_v2, %v1542_v0 }
 0x2a9   : > { %v1071_v4 = vpop.f32.mrf.mxu0 }
 0x2aa   : > { %v1072_v5 = vadd.f32 %v1071_v4, %v969_v1  ;;  %v1099_v13 = vadd.f32 %v1475_v39, %v1080_v6 }
 0x2ab   : > { %v1559_v7 = vpop.f32.mrf.mxu0 }
 0x2ac   : > { %v1083_v8 = vadd.f32 %v1559_v7, %v1543_v3  ;;  %v1097_v37 = vadd.f32 %v1475_v39, %v1072_v5  ;;  %v1107_v15 = vmax.f32 %v1099_v13, 0.0 }
 0x2ad   : > { %v1074_v10 = vpop.f32.mrf.mxu0 }
 0x2ae   : > { %v1100_v11 = vadd.f32 %v1475_v39, %v1083_v8  ;;  %v1075_v12 = vadd.f32 %v1074_v10, %v972_v9  ;;  %v1105_v45 = vmax.f32 %v1097_v37, 0.0 }
 0x2b0   : > { %v1098_v43 = vadd.f32 %v1475_v39, %v1075_v12  ;;  %v1108_v14 = vmax.f32 %v1100_v11, 0.0 }
 0x2b2   : > { %v1106_v40 = vmax.f32 %v1098_v43, 0.0  ;;  %v1112_v17 = vpack.c.bf16 %v1108_v14, %v1107_v15 }
 0x2b4   : > { %v1111_v16 = vpack.c.bf16 %v1106_v40, %v1105_v45 }
 0x2b6   : > { %1572 = vmatprep.mubr.msk.bf16.mxu1 %vm1008_vm10, %v1111_v16 }
 0x2b7   : > { %1573 = vmatmul.mubr.msk.bf16.gmra.mxu1 %vm1008_vm10, %v1112_v17 }
 0x331   : > { %v1570_v18 = vpop.f32.mrf.mxu1 }
 0x332   : > { %v1207_v28 = vadd.f32 %v1570_v18, %v1476_v19 }
 0x333   : > { %v1198_v20 = vpop.f32.mrf.mxu1 }
 0x334   : > { %v1199_v21 = vadd.f32 %v1476_v19, %v1198_v20  ;;  %v1231_v30 = vmax.f32 %v1207_v28, 0.0 }
 0x335   : > { %v1571_v22 = vpop.f32.mrf.mxu1 }
 0x336   : > { %v1229_v24 = vmax.f32 %v1199_v21, 0.0  ;;  %v1210_v31 = vadd.f32 %v1571_v22, %v1476_v19 }
 0x337   : > { %v1201_v25 = vpop.f32.mrf.mxu1 }
 0x338   : > { %v1202_v27 = vadd.f32 %v1476_v19, %v1201_v25  ;;  %1237 = vxpose.xlu1.b32.start [1/8] (short) (narrow) %v1229_v24, 32  ;;  %v1232_v32 = vmax.f32 %v1210_v31, 0.0 }
 0x33a   : > { %v1230_v29 = vmax.f32 %v1202_v27, 0.0 }
 0x33c   : > { %1238 = vxpose.xlu1.b32.cont [2/8] (short) (narrow) %v1230_v29, 32 }
 0x340   : > { %1239 = vxpose.xlu1.b32.cont [3/8] (short) (narrow) %v1231_v30, 32 }
 0x344   : > { %1240 = vxpose.xlu1.b32.cont [4/8] (short) (narrow) %v1232_v32, 32 }
 0x377   : > { %v1574_v33 = vpop.f32.mrf.mxu1 }
 0x378   : > { %v1223_v42 = vadd.f32 %v1574_v33, %v1476_v19 }
 0x379   : > { %v1214_v34 = vpop.f32.mrf.mxu1 }
 0x37a   : > { %v1215_v35 = vadd.f32 %v1476_v19, %v1214_v34  ;;  %v1235_v46 = vmax.f32 %v1223_v42, 0.0 }
 0x37b   : > { %v1575_v36 = vpop.f32.mrf.mxu1 }
 0x37c   : > { %v1233_v38 = vmax.f32 %v1215_v35, 0.0  ;;  %v1226_v47 = vadd.f32 %v1575_v36, %v1476_v19 }
 0x37d   : > { %v1217_v41 = vpop.f32.mrf.mxu1 }
 0x37e   : > { %v1218_v26 = vadd.f32 %v1476_v19, %v1217_v41  ;;  %1241 = vxpose.xlu1.b32.cont [5/8] (short) (narrow) %v1233_v38, 32  ;;  %v1236_v48 = vmax.f32 %v1226_v47, 0.0 }
 0x380   : > { %v1234_v44 = vmax.f32 %v1218_v26, 0.0 }
 0x382   : > { %1242 = vxpose.xlu1.b32.cont [6/8] (short) (narrow) %v1234_v44, 32 }
 0x386   : > { %1243 = vxpose.xlu1.b32.cont [7/8] (short) (narrow) %v1235_v46, 32 }
 0x38a   : > { %1244 = vxpose.xlu1.b32.end [8/8] (short) (narrow) %v1236_v48, 32 }
 0x3ea   : > { %v1253_v49 = vpop.trf.xlu1 }
 0x3eb   : > { %1269 = vst.msk [vmem:[%s417_s20] sm:$0xff] %vm1008_vm10, %v1253_v49 }
 0x3ee   : > { %v1254_v50 = vpop.trf.xlu1 }
 0x3ef   : > { %1270 = vst.msk [vmem:[%s417_s20 + $0x8] sm:$0xff] %vm1008_vm10, %v1254_v50 }
 0x3f2   : > { %v1255_v23 = vpop.trf.xlu1 }
 0x3f3   : > { %1271 = vst.msk [vmem:[%s417_s20 + $0x10] sm:$0xff] %vm1008_vm10, %v1255_v23 }
 0x3f6   : > { %v1256_v39 = vpop.trf.xlu1 }
 0x3f7   : > { %1272 = vst.msk [vmem:[%s417_s20 + $0x18] sm:$0xff] %vm1008_vm10, %v1256_v39 }
 0x3f8   : > { %1687 = shalt.err (!%p1684_p5)
}
 0x3f9   : > { %s1688_s16 = scalar_lea.hbm %s2048_s28, 512  ;;  %s1692_s26 = scalar_lea.hbm %s2105_s9, 1024 }
 0x3fa   : > { %p1689_p6 = scmp.ne.s32.totalorder %s2048_s28, %s1688_s16  ;;  %p1693_p10 = scmp.lt.s32.totalorder %s2048_s28, %s2105_s9 }
 0x3fb   : > { %p1694_p11 = scmp.lt.s32.totalorder %s1692_s26, %s1688_s16 }
 0x3fc   : > { %p1690_p7 = pnand %p1689_p6, %p1849_p4 }
 0x3fd   : > { %p1695_p12 = por %p1694_p11, %p1693_p10 }
 0x3fe   : > { %p1691_p9 = pneg %p1690_p7 }
 0x400   : > { %p1696_p13 = pnand %p1695_p12, %p1691_p9 }
 0x402   : > { %1699 = shalt.err (!%p1696_p13)
}
 0x403   : > { %s1757_s15 = smov 128   ;;  %s1758_s23 = smov 8  }
 0x404   : > { %1576 = dma.vmem_to_hbm [thread:$0]  (%p1849_p4), %s2043_s24, 512, %s2048_s28, %s2051_s29, %s1757_s15, %s1757_s15, %s1758_s23  }
 0x405 PF: > { %p1582_p0 = scmp.ge.s32.totalorder %s1750_s14, 2  ;;  %s1303_s18 = sand.u32 1, %s1730_s30  }
 0x406   : > { %s1304_s16 = scalar_lea.sflag [#allocation3], %s1303_s18 }
 0x407   : > { %p1579_p1 = pnand %p1582_p0, %p1856_p8 }
 0x409   : > { %p1580_p2 = pneg %p1579_p1 }
 0x40b   : > { %1725 = dma.done.wait (%p1580_p2), %s1304_s16, 512  }
 0x40c   : > { %1727 = vsyncadd (%p1580_p2), %s1304_s16, 4294966784  ;;  %s22_s14 = sadd.s32 1, %s1750_s14   ;;  %s2108_s30 = smov %s1734_s10 }
 0x40d   : > { %p19_p3 = scmp.ge.s32.totalorder %s22_s14, 4   ;;  %s2109_s10 = smov %s1738_s11 }
 0x40e   : > { %s2110_s11 = smov %s1862_s22  ;;  %s2111_s12 = smov %s1746_s13 }
 0x40f   : > { %s2112_s13 = smov %s2114_s17  ;;  %21 = sbr.rel (!%p19_p3) target bundleno = 4 (0x4), region = 100 }
 0x414   :  { %1309 = vsyncpa [#allocation3], 1 }
 0x415   :  { %1311 = vsyncpa [#allocation3 + $0x1], 1 }

</bundles_post_ra>
